<compile_context>
chip_gen: v7x
topology: tpu7x:2x2x1
jax: 0.10.0
libtpu: 0.0.40
codegen_flags: <defaults>
</compile_context>

<pallas_src>
import jax
import jax.numpy as jnp
from jax.experimental import pallas as pl
from jax.experimental.pallas import tpu as pltpu


def _downsample_kernel(x_ref, w_ref, b_ref, o_ref):
    # x_ref: (2*Hblk, Wd, C)  de-interleaved, padded, halo'ed rows for one
    #        (batch, row-tile).  Rows [0, Hblk) hold the EVEN padded columns,
    #        rows [Hblk, 2*Hblk) hold the ODD padded columns.  Hblk = 2*tHo+1.
    # w_ref: (9*C, C)   im2col weight, row index = (kh*3 + kw)*C + cin
    # b_ref: (1, C)     bias
    # o_ref: (tHo, Wo, C)
    tHo, Wo, C = o_ref.shape
    Hblk = x_ref.shape[0] // 2

    taps = []
    for kh in range(3):
        for kw in range(3):
            par = kw % 2          # even(0)/odd(1) padded-column plane
            w0 = kw // 2          # column offset inside that plane
            # contiguous along W (sublane) and C (lane); stride-2 only on the
            # outer H axis -> plain addressing, no gathered loads.
            tap = x_ref[pl.ds(par * Hblk + kh, tHo, stride=2),
                        pl.ds(w0, Wo), :]
            taps.append(tap.reshape(tHo * Wo, C))

    patches = jnp.concatenate(taps, axis=-1)              # (tHo*Wo, 9*C)
    acc = jnp.dot(patches, w_ref[...],                     # single K=9C matmul
                  preferred_element_type=jnp.float32)
    acc = acc + b_ref[...].astype(jnp.float32)             # (1, C) broadcast
    o_ref[...] = acc.reshape(tHo, Wo, C).astype(o_ref.dtype)


def _tile_cost_bytes(t, Wo, Wd, C, itemsize):
    in_blk = 2 * (2 * t + 1) * Wd * C * itemsize           # one input block
    out_blk = t * Wo * C * itemsize                        # one output block
    im2col = t * Wo * 9 * C * itemsize + t * Wo * C * 4    # patches + f32 acc
    weights = (9 * C * C + C) * 4
    return 2 * (in_blk + out_blk) + im2col + weights       # double-buffered I/O


def _pick_row_tile(Ho, Wo, Wd, C, itemsize, vmem_cap):
    budget = vmem_cap // 3                                  # leave headroom
    best = 1
    for t in range(1, Ho + 1):
        if Ho % t:
            continue
        if _tile_cost_bytes(t, Wo, Wd, C, itemsize) <= budget:
            best = t
    return best


def downsample(x_nchw, weight_oihw, bias):
    """Forward of DownSample: Conv2d(C, C, 3, stride=2, padding=1).

    x_nchw:      (B, C, H, W)   weight_oihw: (C, C, 3, 3)   bias: (C,)
    returns:     (B, C, Ho, Wo) with Ho = (H+2-3)//2 + 1, Wo likewise.
    """
    B, C, H, W = x_nchw.shape
    Ho = (H - 1) // 2 + 1
    Wo = (W - 1) // 2 + 1
    Hp = H + 2
    Wd = Wo + 1                               # columns needed per parity plane
    itemsize = jnp.dtype(x_nchw.dtype).itemsize

    try:
        vmem_cap = int(pltpu.get_tpu_info().vmem_capacity_bytes)
    except Exception:
        vmem_cap = 64 * 1024 * 1024           # safe for v5e/v6e/v7x

    tHo = _pick_row_tile(Ho, Wo, Wd, C, itemsize, vmem_cap)
    nT = Ho // tHo
    Hblk = 2 * tHo + 1

    # ---- wrapper glue: one fused layout pass (transpose+pad+deinterleave+halo)
    x_nhwc = jnp.transpose(x_nchw, (0, 2, 3, 1))                       # (B,H,W,C)
    x_pad = jnp.pad(x_nhwc, ((0, 0), (1, 1), (1, 2 * Wd - W - 1), (0, 0)))
    x_deint = x_pad.reshape(B, Hp, Wd, 2, C).transpose(0, 3, 1, 2, 4)  # (B,2,Hp,Wd,C)
    row_ids = 2 * tHo * jnp.arange(nT)[:, None] + jnp.arange(Hblk)[None, :]
    x_tiles = x_deint[:, :, row_ids]                                   # (B,2,nT,Hblk,Wd,C)
    x_tiles = x_tiles.transpose(0, 2, 1, 3, 4, 5).reshape(B, nT, 2 * Hblk, Wd, C)

    # im2col weight: row index = (kh*3 + kw)*C + cin, matching the tap concat.
    w2 = jnp.transpose(weight_oihw, (2, 3, 1, 0)).reshape(9 * C, C)
    b2 = bias.reshape(1, C)

    tile_cost = _tile_cost_bytes(tHo, Wo, Wd, C, itemsize)
    vmem_limit = int(min(vmem_cap, max(32 * 1024 * 1024, 2 * tile_cost)))

    flops = 2 * B * Ho * Wo * 9 * C * C + B * Ho * Wo * C
    bytes_accessed = int((x_tiles.size + B * Ho * Wo * C) * itemsize
                         + (w2.size + C) * jnp.dtype(weight_oihw.dtype).itemsize)

    out_nhwc = pl.pallas_call(
        _downsample_kernel,
        out_shape=jax.ShapeDtypeStruct((B, Ho, Wo, C), x_nchw.dtype),
        grid=(B, nT),
        in_specs=[
            pl.BlockSpec((None, None, 2 * Hblk, Wd, C),
                         lambda b, i: (b, i, 0, 0, 0)),                # halo'ed row tile
            pl.BlockSpec((9 * C, C), lambda b, i: (0, 0)),             # resident weight
            pl.BlockSpec((1, C), lambda b, i: (0, 0)),                 # bias
        ],
        out_specs=pl.BlockSpec((None, tHo, Wo, C), lambda b, i: (b, i, 0, 0)),
        compiler_params=pltpu.CompilerParams(
            dimension_semantics=("parallel", "parallel"),
            vmem_limit_bytes=vmem_limit,
        ),
        cost_estimate=pl.CostEstimate(
            flops=flops, transcendentals=0, bytes_accessed=bytes_accessed),
    )(x_tiles, w2, b2)

    return jnp.transpose(out_nhwc, (0, 3, 1, 2))   # back to NCHW


if __name__ == "__main__":
    B, C, H, W = 2, 4, 16, 16

    key = jax.random.PRNGKey(0)
    kx, kw, kb = jax.random.split(key, 3)

    x = jax.random.normal(kx, (B, C, H, W), dtype=jnp.float32)
    # Deterministic synthetic parameters (shapes per nn.Conv2d(C, C, 3)):
    fan_in = C * 3 * 3
    bound = 1.0 / (fan_in ** 0.5)
    weight = jax.random.uniform(kw, (C, C, 3, 3), jnp.float32, -bound, bound)
    bias = jax.random.uniform(kb, (C,), jnp.float32, -bound, bound)

    fn = jax.jit(downsample)
    out = jax.block_until_ready(fn(x, weight, bias))

    # Reference check against XLA's conv (same semantics as the PyTorch module).
    ref = jax.lax.conv_general_dilated(
        x, weight, window_strides=(2, 2), padding=((1, 1), (1, 1)),
        dimension_numbers=("NCHW", "OIHW", "NCHW"),
    ) + bias[None, :, None, None]

    assert out.shape == (B, C, H // 2, W // 2), out.shape
    assert jnp.allclose(out, ref, atol=1e-5, rtol=1e-5), float(
        jnp.max(jnp.abs(out - ref))
    )
    print("KERNEL_OK")
</pallas_src>

<mosaic_0001>
module attributes {stable_mosaic.version = 11 : i64} {
  func.func @_downsample_kernel(%arg0: i32, %arg1: i32, %arg2: memref<1x1x34x9x4xf32, #tpu.memory_space<vmem>>, %arg3: memref<36x4xf32, #tpu.memory_space<vmem>>, %arg4: memref<1x4xf32, #tpu.memory_space<vmem>>, %arg5: memref<1x8x8x4xf32, #tpu.memory_space<vmem>>) attributes {dimension_semantics = [#tpu.dimension_semantics<parallel>, #tpu.dimension_semantics<parallel>], iteration_bounds = array<i64: 2, 1>, scalar_prefetch = 0 : i64, scratch_operands = 0 : i64, tpu.core_type = #tpu.core_type<tc>, window_params = [{transform_indices = @transform_0, window_bounds = array<i64: 1, 1, 34, 9, 4>}, {pipeline_mode = #tpu.pipeline_mode<synchronous>, transform_indices = @transform_1, window_bounds = array<i64: 36, 4>}, {pipeline_mode = #tpu.pipeline_mode<synchronous>, transform_indices = @transform_2, window_bounds = array<i64: 1, 4>}, {transform_indices = @transform_3, window_bounds = array<i64: 1, 8, 8, 4>}]} {
    %c0 = arith.constant 0 : index
    %c0_0 = arith.constant 0 : index
    %c0_1 = arith.constant 0 : index
    %c0_2 = arith.constant 0 : index
    %c0_3 = arith.constant 0 : index
    %0 = tpu.strided_load %arg2[%c0, %c0_0, %c0_1, %c0_2, %c0_3] {strides = array<i32: 1, 1, 2, 1, 1>} : memref<1x1x34x9x4xf32, #tpu.memory_space<vmem>>, vector<1x1x8x8x4xf32>
    %1 = vector.shape_cast %0 : vector<1x1x8x8x4xf32> to vector<8x8x4xf32>
    %2 = vector.shape_cast %1 : vector<8x8x4xf32> to vector<64x4xf32>
    %c0_4 = arith.constant 0 : index
    %c0_5 = arith.constant 0 : index
    %c17 = arith.constant 17 : index
    %c0_6 = arith.constant 0 : index
    %c0_7 = arith.constant 0 : index
    %3 = tpu.strided_load %arg2[%c0_4, %c0_5, %c17, %c0_6, %c0_7] {strides = array<i32: 1, 1, 2, 1, 1>} : memref<1x1x34x9x4xf32, #tpu.memory_space<vmem>>, vector<1x1x8x8x4xf32>
    %4 = vector.shape_cast %3 : vector<1x1x8x8x4xf32> to vector<8x8x4xf32>
    %5 = vector.shape_cast %4 : vector<8x8x4xf32> to vector<64x4xf32>
    %c0_8 = arith.constant 0 : index
    %c0_9 = arith.constant 0 : index
    %c0_10 = arith.constant 0 : index
    %c1 = arith.constant 1 : index
    %c0_11 = arith.constant 0 : index
    %6 = tpu.strided_load %arg2[%c0_8, %c0_9, %c0_10, %c1, %c0_11] {strides = array<i32: 1, 1, 2, 1, 1>} : memref<1x1x34x9x4xf32, #tpu.memory_space<vmem>>, vector<1x1x8x8x4xf32>
    %7 = vector.shape_cast %6 : vector<1x1x8x8x4xf32> to vector<8x8x4xf32>
    %8 = vector.shape_cast %7 : vector<8x8x4xf32> to vector<64x4xf32>
    %c0_12 = arith.constant 0 : index
    %c0_13 = arith.constant 0 : index
    %c1_14 = arith.constant 1 : index
    %c0_15 = arith.constant 0 : index
    %c0_16 = arith.constant 0 : index
    %9 = tpu.strided_load %arg2[%c0_12, %c0_13, %c1_14, %c0_15, %c0_16] {strides = array<i32: 1, 1, 2, 1, 1>} : memref<1x1x34x9x4xf32, #tpu.memory_space<vmem>>, vector<1x1x8x8x4xf32>
    %10 = vector.shape_cast %9 : vector<1x1x8x8x4xf32> to vector<8x8x4xf32>
    %11 = vector.shape_cast %10 : vector<8x8x4xf32> to vector<64x4xf32>
    %c0_17 = arith.constant 0 : index
    %c0_18 = arith.constant 0 : index
    %c18 = arith.constant 18 : index
    %c0_19 = arith.constant 0 : index
    %c0_20 = arith.constant 0 : index
    %12 = tpu.strided_load %arg2[%c0_17, %c0_18, %c18, %c0_19, %c0_20] {strides = array<i32: 1, 1, 2, 1, 1>} : memref<1x1x34x9x4xf32, #tpu.memory_space<vmem>>, vector<1x1x8x8x4xf32>
    %13 = vector.shape_cast %12 : vector<1x1x8x8x4xf32> to vector<8x8x4xf32>
    %14 = vector.shape_cast %13 : vector<8x8x4xf32> to vector<64x4xf32>
    %c0_21 = arith.constant 0 : index
    %c0_22 = arith.constant 0 : index
    %c1_23 = arith.constant 1 : index
    %c1_24 = arith.constant 1 : index
    %c0_25 = arith.constant 0 : index
    %15 = tpu.strided_load %arg2[%c0_21, %c0_22, %c1_23, %c1_24, %c0_25] {strides = array<i32: 1, 1, 2, 1, 1>} : memref<1x1x34x9x4xf32, #tpu.memory_space<vmem>>, vector<1x1x8x8x4xf32>
    %16 = vector.shape_cast %15 : vector<1x1x8x8x4xf32> to vector<8x8x4xf32>
    %17 = vector.shape_cast %16 : vector<8x8x4xf32> to vector<64x4xf32>
    %c0_26 = arith.constant 0 : index
    %c0_27 = arith.constant 0 : index
    %c2 = arith.constant 2 : index
    %c0_28 = arith.constant 0 : index
    %c0_29 = arith.constant 0 : index
    %18 = tpu.strided_load %arg2[%c0_26, %c0_27, %c2, %c0_28, %c0_29] {strides = array<i32: 1, 1, 2, 1, 1>} : memref<1x1x34x9x4xf32, #tpu.memory_space<vmem>>, vector<1x1x8x8x4xf32>
    %19 = vector.shape_cast %18 : vector<1x1x8x8x4xf32> to vector<8x8x4xf32>
    %20 = vector.shape_cast %19 : vector<8x8x4xf32> to vector<64x4xf32>
    %c0_30 = arith.constant 0 : index
    %c0_31 = arith.constant 0 : index
    %c19 = arith.constant 19 : index
    %c0_32 = arith.constant 0 : index
    %c0_33 = arith.constant 0 : index
    %21 = tpu.strided_load %arg2[%c0_30, %c0_31, %c19, %c0_32, %c0_33] {strides = array<i32: 1, 1, 2, 1, 1>} : memref<1x1x34x9x4xf32, #tpu.memory_space<vmem>>, vector<1x1x8x8x4xf32>
    %22 = vector.shape_cast %21 : vector<1x1x8x8x4xf32> to vector<8x8x4xf32>
    %23 = vector.shape_cast %22 : vector<8x8x4xf32> to vector<64x4xf32>
    %c0_34 = arith.constant 0 : index
    %c0_35 = arith.constant 0 : index
    %c2_36 = arith.constant 2 : index
    %c1_37 = arith.constant 1 : index
    %c0_38 = arith.constant 0 : index
    %24 = tpu.strided_load %arg2[%c0_34, %c0_35, %c2_36, %c1_37, %c0_38] {strides = array<i32: 1, 1, 2, 1, 1>} : memref<1x1x34x9x4xf32, #tpu.memory_space<vmem>>, vector<1x1x8x8x4xf32>
    %25 = vector.shape_cast %24 : vector<1x1x8x8x4xf32> to vector<8x8x4xf32>
    %26 = vector.shape_cast %25 : vector<8x8x4xf32> to vector<64x4xf32>
    %27 = tpu.concatenate %2, %5, %8, %11, %14, %17, %20, %23, %26 in 1 : vector<64x4xf32>, vector<64x4xf32>, vector<64x4xf32>, vector<64x4xf32>, vector<64x4xf32>, vector<64x4xf32>, vector<64x4xf32>, vector<64x4xf32>, vector<64x4xf32> -> vector<64x36xf32>
    %c0_39 = arith.constant 0 : index
    %c0_40 = arith.constant 0 : index
    %28 = vector.load %arg3[%c0_39, %c0_40] : memref<36x4xf32, #tpu.memory_space<vmem>>, vector<36x4xf32>
    %cst = arith.constant dense<0.000000e+00> : vector<64x4xf32>
    %29 = tpu.matmul %27, %28, %cst {dimension_numbers = #tpu.dot_dimension_numbers<[1], [0], [0], [1], [0, 0, 1, 1], [], []>} : vector<64x36xf32>, vector<36x4xf32>, vector<64x4xf32> -> vector<64x4xf32>
    %c0_41 = arith.constant 0 : index
    %c0_42 = arith.constant 0 : index
    %30 = vector.load %arg4[%c0_41, %c0_42] : memref<1x4xf32, #tpu.memory_space<vmem>>, vector<1x4xf32>
    %31 = vector.broadcast %30 : vector<1x4xf32> to vector<64x4xf32>
    %32 = arith.addf %29, %31 : vector<64x4xf32>
    %33 = vector.shape_cast %32 : vector<64x4xf32> to vector<8x8x4xf32>
    %c0_43 = arith.constant 0 : index
    %c0_44 = arith.constant 0 : index
    %c0_45 = arith.constant 0 : index
    %c0_46 = arith.constant 0 : index
    %34 = vector.load %arg5[%c0_43, %c0_44, %c0_45, %c0_46] : memref<1x8x8x4xf32, #tpu.memory_space<vmem>>, vector<1x8x8x4xf32>
    %35 = vector.shape_cast %34 : vector<1x8x8x4xf32> to vector<8x8x4xf32>
    %36 = vector.shape_cast %33 : vector<8x8x4xf32> to vector<1x8x8x4xf32>
    tpu.vector_store %arg5[%c0_43, %c0_44, %c0_45, %c0_46], %36 {strides = array<i32>} : memref<1x8x8x4xf32, #tpu.memory_space<vmem>>, vector<1x8x8x4xf32>,
    return
  }
  func.func @transform_0(%arg0: i32, %arg1: i32) -> (i32, i32, i32, i32, i32) {
    %c0_i32 = arith.constant 0 : i32
    %c0_i32_0 = arith.constant 0 : i32
    %c0_i32_1 = arith.constant 0 : i32
    %c0_i32_2 = arith.constant 0 : i32
    return %arg0, %arg1, %c0_i32, %c0_i32_0, %c0_i32_1 : i32, i32, i32, i32, i32
  }
  func.func @transform_1(%arg0: i32, %arg1: i32) -> (i32, i32) {
    %c0_i32 = arith.constant 0 : i32
    %c0_i32_0 = arith.constant 0 : i32
    %c0_i32_1 = arith.constant 0 : i32
    return %c0_i32, %c0_i32_0 : i32, i32
  }
  func.func @transform_2(%arg0: i32, %arg1: i32) -> (i32, i32) {
    %c0_i32 = arith.constant 0 : i32
    %c0_i32_0 = arith.constant 0 : i32
    %c0_i32_1 = arith.constant 0 : i32
    return %c0_i32, %c0_i32_0 : i32, i32
  }
  func.func @transform_3(%arg0: i32, %arg1: i32) -> (i32, i32, i32, i32) {
    %c0_i32 = arith.constant 0 : i32
    %c0_i32_0 = arith.constant 0 : i32
    %c0_i32_1 = arith.constant 0 : i32
    return %arg0, %arg1, %c0_i32, %c0_i32_0 : i32, i32, i32, i32
  }
}

</mosaic_0001>

<bundles_post_ra>
// kernel: downsample.1
= control target key start
LH: loop header
LB: loop body
LE: loop exit
PB: predicated region body
PF: predicated region fallthrough
CT: control target
= control target key end

     0   :  { %s1068_s12 = smov 0   ;;  %s1070_s13 = smov 0   ;;  %s1422_s0 = inlined_call_operand.vmem [shape: f32[2,1,34,9,4], index: 0, kind: input, shape index: {}]   ;;  %s1423_s1 = inlined_call_operand.vmem [shape: f32[36,4], index: 1, kind: input, shape index: {}]   ;;  %s1424_s2 = inlined_call_operand.vmem [shape: f32[1,4], index: 2, kind: input, shape index: {}]   ;;  %s1425_s3 = inlined_call_operand.vmem [shape: f32[2,8,8,4], index: 3, kind: output, shape index: {}]  }
   0x1   :  { %s1072_s14 = smov 0  }
   0x2 LB: > { %s25_s15 = sadd.s32 1, %s1034_s13  ;;  %p861_p0 = scmp.ge.s32.totalorder %s1038_s14, 1  ;;  %s1038_s14 = sphi %s1072_s14, %s13_s14   ;;  %s1034_s13 = sphi %s1070_s13, %s1427_s13   ;;  %s1030_s12 = sphi %s1068_s12, %s1426_s12  }
   0x3   : > { %p27_p1 = scmp.ge.s32.totalorder %s25_s15, 2  ;;  %p157_p2 = scmp.lt.s32.totalorder %s1038_s14, 3 }
   0x5   : > { %s1429_s15 = smov (%p27_p1, %s25_s15), 0  ;;  %p158_p3 = pnand %p861_p0, %p157_p2 }
   0x6   : > { %p189_p4 = scmp.lt.s32.totalorder (!%p158_p3), %s1030_s12, 1  ;;  %s1040_s20 = smov (!%p158_p3), 4   ;;  %v613_v36 = vld [vmem:[%s1423_s1] sm:$0xff] (!%p158_p3)  ;;  %v614_v37 = vld [vmem:[%s1423_s1 + $0x8] sm:$0xff] (!%p158_p3)  ;;  %v615_v41 = vld [vmem:[%s1423_s1 + $0x10] sm:$0xff] (!%p158_p3)  ;;  %vm650_vm0 = vcmask (!%p158_p3), 1043456  }
   0x7   : > { %161 = sbr.rel (%p158_p3) target bundleno = 476 (0x1dc), region = 32  ;;  %s1041_s21 = smov (!%p158_p3), 8   ;;  %v969_v38 = vpack.c.bf16 (!%p158_p3), %v614_v37, %v613_v36  ;;  %v616_v42 = vld [vmem:[%s1423_s1 + $0x18] sm:$0xff] (!%p158_p3)  ;;  %v617_v44 = vld [vmem:[%s1423_s1 + $0x20] sm:$0xf] (!%p158_p3)  ;;  %vm541_vm1 = vcmask (!%p158_p3), 31744  }
   0x8   : > { %s1042_s22 = smov (!%p158_p3), 12   ;;  %s1043_s23 = smov (!%p158_p3), 16   ;;  %v973_v43 = vpack.c.bf16 (!%p158_p3), %v616_v42, %v615_v41  ;;  %vm550_vm2 = vcmask (!%p158_p3), 64512   ;;  %vm559_vm3 = vcmask (!%p158_p3), 97280   ;;  %vm568_vm4 = vcmask (!%p158_p3), 130048  }
   0x9   : > { %s1044_s24 = smov (!%p158_p3), 20   ;;  %s1045_s25 = smov (!%p158_p3), 24   ;;  %970 = vmatprep.subr.bf16.mxu0 (!%p158_p3), %v969_v38  ;;  %977 = vmatprep.subr.bf16.mxu1 (!%p158_p3), %v969_v38  ;;  %vm577_vm5 = vcmask (!%p158_p3), 162816   ;;  %vm586_vm6 = vcmask (!%p158_p3), 195584   ;;  %vm595_vm7 = vcmask (!%p158_p3), 228352   ;;  %vm604_vm8 = vcmask (!%p158_p3), 261120  }
   0xa   : > { %s1046_s26 = smov (!%p158_p3), 28   ;;  %972 = vmatpush3.bf16.msra.mxu0 (!%p158_p3), %v969_v38  ;;  %980 = vmatpush3.bf16.msra.mxu1 (!%p158_p3), %v969_v38  ;;  %s1047_s10 = smov (!%p158_p3), 32   ;;  %vm625_vm9 = vcmask (!%p158_p3), 293888  }
   0xb   : > { %974 = vmatprep.subr.bf16.mxu0 (!%p158_p3), %v973_v43  ;;  %978 = vmatprep.subr.bf16.mxu1 (!%p158_p3), %v973_v43 }
   0xe   : > { %s1431_s12 = smov (!%p189_p4, %s1030_s12), 1  ;;  %976 = vmatpush3.bf16.msra.mxu0 %v973_v43  ;;  %981 = vmatpush3.bf16.msra.mxu1 %v973_v43 }
   0xf   : > { %s983_s16 = smul.u32 544, %s1431_s12  ;;  %955 = vmatprep.subr.msk.mxu0 %vm650_vm0, %v617_v44  ;;  %979 = vmatprep.subr.msk.mxu1 %vm650_vm0, %v617_v44  ;;  %s933_s11 = sshll.u32 %s1431_s12, 6 }
  0x11   : > { %s1092_s19 = scalar_lea.vmem %s1422_s0, %s983_s16 }
  0x12   : > { %v1095_v0 = vld [vmem:[%s1092_s19 + $0x130] sm:$0xff]  ;;  %v1112_v4 = vld [vmem:[%s1092_s19 + $0x81] sm:$0xff]  ;;  %956 = vmatpush3.msk.msra.mxu0 %vm650_vm0, %v617_v44  ;;  %982 = vmatpush3.msk.msra.mxu1 %vm650_vm0, %v617_v44 }
  0x13   : > { %v865_v1 = vld [vmem:[%s1092_s19 + $0x110] sm:$0xff]  ;;  %295 = vrot.lane.b32.xlu1 %v1095_v0, %s1040_s20  ;;  %v225_v5 = vld [vmem:[%s1092_s19 + $0x1] sm:$0xff] }
  0x14   : > { %293 = vrot.lane.b32.xlu0 %v865_v1, %s1040_s20  ;;  %v1102_v2 = vld [vmem:[%s1092_s19 + $0x1b0] sm:$0xff]  ;;  %v1119_v6 = vld [vmem:[%s1092_s19 + $0xa1] sm:$0xff] }
  0x15   : > { %v1105_v3 = vld [vmem:[%s1092_s19 + $0x190] sm:$0xff]  ;;  %v1122_v7 = vld [vmem:[%s1092_s19 + $0x21] sm:$0xff] }
  0x16   : > { %v877_v8 = vld [vmem:[%s1092_s19 + $0x90] sm:$0xff]  ;;  %v885_v12 = vld [vmem:[%s1092_s19 + $0x1a0] sm:$0xff] }
  0x17   : > { %303 = vrot.lane.b32.xlu1 %v1102_v2, %s1040_s20  ;;  %v873_v9 = vld [vmem:[%s1092_s19 + $0x10] sm:$0xff]  ;;  %v881_v13 = vld [vmem:[%s1092_s19 + $0x120] sm:$0xff] }
  0x18   : > { %301 = vrot.lane.b32.xlu0 %v1105_v3, %s1040_s20  ;;  %v878_v10 = vld [vmem:[%s1092_s19 + $0xb0] sm:$0xff]  ;;  %v886_v16 = vld [vmem:[%s1092_s19 + $0x1c0] sm:$0xff] }
  0x19   : > { %v874_v11 = vld [vmem:[%s1092_s19 + $0x30] sm:$0xff]  ;;  %v882_v17 = vld [vmem:[%s1092_s19 + $0x140] sm:$0xff] }
  0x1a   : > { %v1141_v14 = vld [vmem:[%s1092_s19 + $0x1d0] sm:$0xff]  ;;  %v1169_v22 = vld [vmem:[%s1092_s19 + $0xc1] sm:$0xff] }
  0x1b   : > { %333 = vrot.lane.b32.xlu1 %v1112_v4, %s1041_s21  ;;  %v1144_v15 = vld [vmem:[%s1092_s19 + $0x150] sm:$0xff]  ;;  %v1172_v23 = vld [vmem:[%s1092_s19 + $0x41] sm:$0xff] }
  0x1c   : > { %325 = vrot.lane.b32.xlu0 %v225_v5, %s1041_s21  ;;  %v893_v18 = vld [vmem:[%s1092_s19 + $0x91] sm:$0xff]  ;;  %v1183_v26 = vld [vmem:[%s1092_s19 + $0xa0] sm:$0xff] }
  0x1d   : > { %v889_v19 = vld [vmem:[%s1092_s19 + $0x11] sm:$0xff]  ;;  %v1186_v27 = vld [vmem:[%s1092_s19 + $0x20] sm:$0xff] }
  0x1e   : > { %v1159_v20 = vld [vmem:[%s1092_s19 + $0x1f0] sm:$0xff]  ;;  %v1193_v28 = vld [vmem:[%s1092_s19 + $0xe1] sm:$0xff] }
  0x1f   : > { %335 = vrot.lane.b32.xlu1 %v1119_v6, %s1041_s21  ;;  %v1162_v21 = vld [vmem:[%s1092_s19 + $0x170] sm:$0xff]  ;;  %v1196_v29 = vld [vmem:[%s1092_s19 + $0x61] sm:$0xff] }
  0x20   : > { %327 = vrot.lane.b32.xlu0 %v1122_v7, %s1041_s21  ;;  %v894_v24 = vld [vmem:[%s1092_s19 + $0xb1] sm:$0xff]  ;;  %v1207_v32 = vld [vmem:[%s1092_s19 + $0xc0] sm:$0xff] }
  0x21   : > { %v890_v25 = vld [vmem:[%s1092_s19 + $0x31] sm:$0xff]  ;;  %v1210_v33 = vld [vmem:[%s1092_s19 + $0x40] sm:$0xff] }
  0x22   : > { %v879_v30 = vld [vmem:[%s1092_s19 + $0xd0] sm:$0xff]  ;;  %v887_v39 = vld [vmem:[%s1092_s19 + $0x1e0] sm:$0xff] }
  0x23   : > { %365 = vrot.lane.b32.xlu1 %v877_v8, %s1042_s22  ;;  %v875_v31 = vld [vmem:[%s1092_s19 + $0x50] sm:$0xff]  ;;  %v883_v40 = vld [vmem:[%s1092_s19 + $0x160] sm:$0xff] }
  0x24   : > { %357 = vrot.lane.b32.xlu0 %v873_v9, %s1042_s22  ;;  %v880_v34 = vld [vmem:[%s1092_s19 + $0xf0] sm:$0xff]  ;;  %v888_v45 = vld [vmem:[%s1092_s19 + $0x200] sm:$0xff] }
  0x25   : > { %v876_v35 = vld [vmem:[%s1092_s19 + $0x70] sm:$0xff]  ;;  %v884_v46 = vld [vmem:[%s1092_s19 + $0x180] sm:$0xff] }
  0x26   : > { %v895_v47 = vld [vmem:[%s1092_s19 + $0xd1] sm:$0xff]  ;;  %v903_v51 = vld [vmem:[%s1092_s19 + $0xe0] sm:$0xff] }
  0x27   : > { %367 = vrot.lane.b32.xlu1 %v878_v10, %s1042_s22  ;;  %v891_v48 = vld [vmem:[%s1092_s19 + $0x51] sm:$0xff]  ;;  %v899_v52 = vld [vmem:[%s1092_s19 + $0x60] sm:$0xff] }
  0x28   : > { %359 = vrot.lane.b32.xlu0 %v874_v11, %s1042_s22  ;;  %v896_v49 = vld [vmem:[%s1092_s19 + $0xf1] sm:$0xff]  ;;  %v904_v53 = vld [vmem:[%s1092_s19 + $0x100] sm:$0xff] }
  0x29   : > { %v892_v50 = vld [vmem:[%s1092_s19 + $0x71] sm:$0xff]  ;;  %v900_v54 = vld [vmem:[%s1092_s19 + $0x80] sm:$0xff] }
  0x2a   : > { %v208_v55 = vld [vmem:[%s1092_s19] sm:$0xff]  ;;  %v912_v56 = vld [vmem:[%s1092_s19 + $0x210] sm:$0xff] }
  0x2b   : > { %397 = vrot.lane.b32.xlu1 %v885_v12, %s1043_s23 }
  0x2c   : > { %389 = vrot.lane.b32.xlu0 %v881_v13, %s1043_s23 }
  0x2f   : > { %305 = vrot.lane.b32.xlu1 %v1141_v14, %s1040_s20 }
  0x30   : > { %297 = vrot.lane.b32.xlu0 %v1144_v15, %s1040_s20 }
  0x33   : > { %399 = vrot.lane.b32.xlu1 %v886_v16, %s1043_s23 }
  0x34   : > { %391 = vrot.lane.b32.xlu0 %v882_v17, %s1043_s23 }
  0x37   : > { %429 = vrot.lane.b32.xlu1 %v893_v18, %s1044_s24 }
  0x38   : > { %421 = vrot.lane.b32.xlu0 %v889_v19, %s1044_s24 }
  0x3b   : > { %307 = vrot.lane.b32.xlu1 %v1159_v20, %s1040_s20 }
  0x3c   : > { %299 = vrot.lane.b32.xlu0 %v1162_v21, %s1040_s20  ;;  %s206_s20 = scalar_lea.vmem %s1425_s3, %s933_s11 }
  0x3f   : > { %337 = vrot.lane.b32.xlu1 %v1169_v22, %s1041_s21 }
  0x40   : > { %329 = vrot.lane.b32.xlu0 %v1172_v23, %s1041_s21 }
  0x43   : > { %431 = vrot.lane.b32.xlu1 %v894_v24, %s1044_s24 }
  0x44   : > { %423 = vrot.lane.b32.xlu0 %v890_v25, %s1044_s24 }
  0x47   : > { %461 = vrot.lane.b32.xlu1 %v1183_v26, %s1045_s25 }
  0x48   : > { %453 = vrot.lane.b32.xlu0 %v1186_v27, %s1045_s25 }
  0x4b   : > { %339 = vrot.lane.b32.xlu1 %v1193_v28, %s1041_s21 }
  0x4c   : > { %331 = vrot.lane.b32.xlu0 %v1196_v29, %s1041_s21 }
  0x4f   : > { %369 = vrot.lane.b32.xlu1 %v879_v30, %s1042_s22 }
  0x50   : > { %361 = vrot.lane.b32.xlu0 %v875_v31, %s1042_s22 }
  0x53   : > { %463 = vrot.lane.b32.xlu1 %v1207_v32, %s1045_s25 }
  0x54   : > { %455 = vrot.lane.b32.xlu0 %v1210_v33, %s1045_s25 }
  0x57   : > { %493 = vrot.lane.b32.xlu1 %v1102_v2, %s1046_s26 }
  0x58   : > { %485 = vrot.lane.b32.xlu0 %v1095_v0, %s1046_s26  ;;  %v920_v0 = vld [vmem:[%s1092_s19 + $0x101] sm:$0xff] }
  0x5b   : > { %371 = vrot.lane.b32.xlu1 %v880_v34, %s1042_s22 }
  0x5c   : > { %363 = vrot.lane.b32.xlu0 %v876_v35, %s1042_s22 }
  0x5f   : > { %401 = vrot.lane.b32.xlu1 %v887_v39, %s1043_s23 }
  0x60   : > { %393 = vrot.lane.b32.xlu0 %v883_v40, %s1043_s23 }
  0x63   : > { %495 = vrot.lane.b32.xlu1 %v1141_v14, %s1046_s26 }
  0x64   : > { %487 = vrot.lane.b32.xlu0 %v1144_v15, %s1046_s26 }
  0x67   : > { %525 = vrot.lane.b32.xlu1 %v1119_v6, %s1047_s10 }
  0x68   : > { %517 = vrot.lane.b32.xlu0 %v1122_v7, %s1047_s10 }
  0x6b   : > { %403 = vrot.lane.b32.xlu1 %v888_v45, %s1043_s23 }
  0x6c   : > { %395 = vrot.lane.b32.xlu0 %v884_v46, %s1043_s23 }
  0x6f   : > { %433 = vrot.lane.b32.xlu1 %v895_v47, %s1044_s24 }
  0x70   : > { %425 = vrot.lane.b32.xlu0 %v891_v48, %s1044_s24 }
  0x73   : > { %527 = vrot.lane.b32.xlu1 %v1169_v22, %s1047_s10 }
  0x74   : > { %519 = vrot.lane.b32.xlu0 %v1172_v23, %s1047_s10 }
  0x77   : > { %435 = vrot.lane.b32.xlu1 %v896_v49, %s1044_s24 }
  0x78   : > { %427 = vrot.lane.b32.xlu0 %v892_v50, %s1044_s24 }
  0x7b   : > { %465 = vrot.lane.b32.xlu1 %v903_v51, %s1045_s25 }
  0x7c   : > { %457 = vrot.lane.b32.xlu0 %v899_v52, %s1045_s25 }
  0x7f   : > { %467 = vrot.lane.b32.xlu1 %v904_v53, %s1045_s25 }
  0x80   : > { %459 = vrot.lane.b32.xlu0 %v900_v54, %s1045_s25 }
  0x83   : > { %497 = vrot.lane.b32.xlu1 %v1159_v20, %s1046_s26 }
  0x84   : > { %489 = vrot.lane.b32.xlu0 %v1162_v21, %s1046_s26 }
  0x85   : > { %v296_v57 = vpop.permute.xlu1 %295 }
  0x86   : > { %v294_v58 = vpop.permute.xlu0 %293  ;;  %v543_v59 = vsel %vm541_vm1, %v1186_v27, %v296_v57 }
  0x87   : > { %v542_v60 = vsel %vm541_vm1, %v208_v55, %v294_v58  ;;  %499 = vrot.lane.b32.xlu1 %v912_v56, %s1046_s26 }
  0x88   : > { %491 = vrot.lane.b32.xlu0 %v1105_v3, %s1046_s26 }
  0x89   : > { %v304_v61 = vpop.permute.xlu1 %303 }
  0x8a   : > { %v302_v62 = vpop.permute.xlu0 %301  ;;  %v547_v3 = vsel %vm541_vm1, %v1183_v26, %v304_v61 }
  0x8b   : > { %v546_v63 = vsel %vm541_vm1, %v900_v54, %v302_v62  ;;  %529 = vrot.lane.b32.xlu1 %v1193_v28, %s1047_s10 }
  0x8c   : > { %521 = vrot.lane.b32.xlu0 %v1196_v29, %s1047_s10 }
  0x8d   : > { %v334_v1 = vpop.permute.xlu1 %333 }
  0x8e   : > { %v326_v2 = vpop.permute.xlu0 %325  ;;  %v555_v5 = vsel %vm550_vm2, %v546_v63, %v334_v1 }
  0x8f   : > { %v551_v6 = vsel %vm550_vm2, %v542_v60, %v326_v2  ;;  %531 = vrot.lane.b32.xlu1 %v920_v0, %s1047_s10 }
  0x90   : > { %523 = vrot.lane.b32.xlu0 %v1112_v4, %s1047_s10 }
  0x91   : > { %v336_v7 = vpop.permute.xlu1 %335 }
  0x92   : > { %v328_v8 = vpop.permute.xlu0 %327  ;;  %v556_v9 = vsel %vm550_vm2, %v547_v3, %v336_v7 }
  0x93   : > { %v552_v10 = vsel %vm550_vm2, %v543_v59, %v328_v8 }
  0x95   : > { %v366_v11 = vpop.permute.xlu1 %365 }
  0x96   : > { %v358_v12 = vpop.permute.xlu0 %357  ;;  %v564_v50 = vsel %vm559_vm3, %v555_v5, %v366_v11 }
  0x99   : > { %v368_v13 = vpop.permute.xlu1 %367 }
  0x9a   : > { %v360_v14 = vpop.permute.xlu0 %359  ;;  %v1303_v15 = vsel %vm559_vm3, %v556_v9, %v368_v13 }
  0x9b   : > { %v1306_v16 = vsel %vm559_vm3, %v552_v10, %v360_v14 }
  0x9d   : > { %v398_v4 = vpop.permute.xlu1 %397 }
  0x9e   : > { %v390_v17 = vpop.permute.xlu0 %389  ;;  %v573_v54 = vsel %vm568_vm4, %v564_v50, %v398_v4 }
  0xa1   : > { %v306_v18 = vpop.permute.xlu1 %305 }
  0xa2   : > { %v298_v19 = vpop.permute.xlu0 %297  ;;  %v548_v28 = vsel %vm541_vm1, %v1207_v32, %v306_v18 }
  0xa3   : > { %v544_v29 = vsel %vm541_vm1, %v1210_v33, %v298_v19 }
  0xa5   : > { %v400_v20 = vpop.permute.xlu1 %399 }
  0xa6   : > { %v392_v21 = vpop.permute.xlu0 %391  ;;  %v574_v7 = vsel %vm568_vm4, %v1303_v15, %v400_v20 }
  0xa7   : > { %v570_v8 = vsel %vm568_vm4, %v1306_v16, %v392_v21 }
  0xa9   : > { %v430_v22 = vpop.permute.xlu1 %429 }
  0xaa   : > { %v422_v23 = vpop.permute.xlu0 %421  ;;  %v582_v56 = vsel %vm577_vm5, %v573_v54, %v430_v22 }
  0xad   : > { %v308_v24 = vpop.permute.xlu1 %307 }
  0xae   : > { %v300_v25 = vpop.permute.xlu0 %299  ;;  %v1309_v26 = vsel %vm541_vm1, %v903_v51, %v308_v24  ;;  %v560_v51 = vsel %vm559_vm3, %v551_v6, %v358_v12 }
  0xaf   : > { %v1312_v27 = vsel %vm541_vm1, %v899_v52, %v300_v25  ;;  %v569_v55 = vsel %vm568_vm4, %v560_v51, %v390_v17 }
  0xb0   : > { %v578_v57 = vsel %vm577_vm5, %v569_v55, %v422_v23 }
  0xb1   : > { %v338_v30 = vpop.permute.xlu1 %337 }
  0xb2   : > { %v330_v31 = vpop.permute.xlu0 %329  ;;  %v1319_v34 = vsel %vm550_vm2, %v548_v28, %v338_v30 }
  0xb3   : > { %v1322_v35 = vsel %vm550_vm2, %v544_v29, %v330_v31 }
  0xb5   : > { %v432_v36 = vpop.permute.xlu1 %431 }
  0xb6   : > { %v424_v37 = vpop.permute.xlu0 %423  ;;  %v583_v9 = vsel %vm577_vm5, %v574_v7, %v432_v36 }
  0xb7   : > { %v579_v10 = vsel %vm577_vm5, %v570_v8, %v424_v37 }
  0xb9   : > { %v462_v38 = vpop.permute.xlu1 %461 }
  0xba   : > { %v454_v39 = vpop.permute.xlu0 %453  ;;  %v591_v58 = vsel %vm586_vm6, %v582_v56, %v462_v38 }
  0xbb   : > { %v587_v59 = vsel %vm586_vm6, %v578_v57, %v454_v39 }
  0xbd   : > { %v1324_v40 = vpop.permute.xlu1 %339 }
  0xbe   : > { %v1326_v41 = vpop.permute.xlu0 %331 }
  0xc1   : > { %v370_v32 = vpop.permute.xlu1 %369 }
  0xc2   : > { %v362_v42 = vpop.permute.xlu0 %361  ;;  %v566_v28 = vsel %vm559_vm3, %v1319_v34, %v370_v32  ;;  %v554_v34 = vsel %vm550_vm2, %v1312_v27, %v1326_v41 }
  0xc3   : > { %v562_v29 = vsel %vm559_vm3, %v1322_v35, %v362_v42 }
  0xc5   : > { %v464_v43 = vpop.permute.xlu1 %463 }
  0xc6   : > { %v456_v33 = vpop.permute.xlu0 %455  ;;  %v592_v11 = vsel %vm586_vm6, %v583_v9, %v464_v43  ;;  %v558_v43 = vsel %vm550_vm2, %v1309_v26, %v1324_v40 }
  0xc7   : > { %v588_v12 = vsel %vm586_vm6, %v579_v10, %v456_v33 }
  0xc9   : > { %v494_v44 = vpop.permute.xlu1 %493 }
  0xca   : > { %v486_v45 = vpop.permute.xlu0 %485  ;;  %v600_v60 = vsel %vm595_vm7, %v591_v58, %v494_v44  ;;  %v921_v58 = vld [vmem:[%s1424_s2] ss:$0 sm:$0xff] }
  0xcb   : > { %v596_v61 = vsel %vm595_vm7, %v587_v59, %v486_v45 }
  0xcd   : > { %v1328_v46 = vpop.permute.xlu1 %371 }
  0xce   : > { %v1330_v47 = vpop.permute.xlu0 %363  ;;  %v567_v42 = vsel %vm559_vm3, %v558_v43, %v1328_v46 }
  0xcf   : > { %v563_v33 = vsel %vm559_vm3, %v554_v34, %v1330_v47 }
  0xd1   : > { %v402_v48 = vpop.permute.xlu1 %401 }
  0xd2   : > { %v394_v49 = vpop.permute.xlu0 %393  ;;  %v575_v36 = vsel %vm568_vm4, %v566_v28, %v402_v48 }
  0xd3   : > { %v571_v37 = vsel %vm568_vm4, %v562_v29, %v394_v49 }
  0xd5   : > { %v496_v52 = vpop.permute.xlu1 %495 }
  0xd6   : > { %v488_v53 = vpop.permute.xlu0 %487  ;;  %v601_v13 = vsel %vm595_vm7, %v592_v11, %v496_v52 }
  0xd7   : > { %v597_v14 = vsel %vm595_vm7, %v588_v12, %v488_v53 }
  0xd9   : > { %v526_v62 = vpop.permute.xlu1 %525 }
  0xda   : > { %v518_v63 = vpop.permute.xlu0 %517  ;;  %v609_v1 = vsel %vm604_vm8, %v600_v60, %v526_v62 }
  0xdb   : > { %v605_v0 = vsel %vm604_vm8, %v596_v61, %v518_v63  ;;  %963 = vmatprep.mubr.msk.f32.mxu1 %vm625_vm9, %v609_v1 }
  0xdc   : > { %957 = vmatprep.mubr.msk.f32.mxu0 %vm625_vm9, %v605_v0 }
  0xdd   : > { %v404_v2 = vpop.permute.xlu1 %403 }
  0xde   : > { %v396_v5 = vpop.permute.xlu0 %395  ;;  %v576_v40 = vsel %vm568_vm4, %v567_v42, %v404_v2 }
  0xdf   : > { %v572_v27 = vsel %vm568_vm4, %v563_v33, %v396_v5 }
  0xe1   : > { %v434_v6 = vpop.permute.xlu1 %433 }
  0xe2   : > { %v426_v3 = vpop.permute.xlu0 %425  ;;  %v584_v38 = vsel %vm577_vm5, %v575_v36, %v434_v6 }
  0xe3   : > { %v580_v39 = vsel %vm577_vm5, %v571_v37, %v426_v3 }
  0xe5   : > { %v528_v4 = vpop.permute.xlu1 %527 }
  0xe6   : > { %v520_v17 = vpop.permute.xlu0 %519  ;;  %v610_v18 = vsel %vm604_vm8, %v601_v13, %v528_v4 }
  0xe7   : > { %v606_v15 = vsel %vm604_vm8, %v597_v14, %v520_v17  ;;  %964 = vmatmul.mubr.msk.f32.vlgmr.msra.gmra.mrb[0].mxu1 %vm625_vm9, %v610_v18 }
  0xe8   : > { %958 = vmatmul.mubr.msk.f32.vlgmr.msra.gmra.mrb[0].mxu0 %vm625_vm9, %v606_v15 }
  0xe9   : > { %v436_v16 = vpop.permute.xlu1 %435 }
  0xea   : > { %v428_v19 = vpop.permute.xlu0 %427  ;;  %v585_v46 = vsel %vm577_vm5, %v576_v40, %v436_v16 }
  0xeb   : > { %v581_v50 = vsel %vm577_vm5, %v572_v27, %v428_v19 }
  0xed   : > { %v466_v20 = vpop.permute.xlu1 %465 }
  0xee   : > { %v458_v21 = vpop.permute.xlu0 %457  ;;  %v593_v35 = vsel %vm586_vm6, %v584_v38, %v466_v20 }
  0xef   : > { %v589_v32 = vsel %vm586_vm6, %v580_v39, %v458_v21 }
  0xf1   : > { %v468_v22 = vpop.permute.xlu1 %467 }
  0xf2   : > { %v460_v23 = vpop.permute.xlu0 %459  ;;  %v594_v47 = vsel %vm586_vm6, %v585_v46, %v468_v22 }
  0xf3   : > { %v590_v51 = vsel %vm586_vm6, %v581_v50, %v460_v23 }
  0xf5   : > { %v498_v24 = vpop.permute.xlu1 %497 }
  0xf6   : > { %v490_v25 = vpop.permute.xlu0 %489  ;;  %v602_v44 = vsel %vm595_vm7, %v593_v35, %v498_v24 }
  0xf7   : > { %v598_v45 = vsel %vm595_vm7, %v589_v32, %v490_v25 }
  0xf9   : > { %v500_v30 = vpop.permute.xlu1 %499 }
  0xfa   : > { %v492_v31 = vpop.permute.xlu0 %491  ;;  %v603_v52 = vsel %vm595_vm7, %v594_v47, %v500_v30 }
  0xfb   : > { %v599_v53 = vsel %vm595_vm7, %v590_v51, %v492_v31 }
  0xfd   : > { %v530_v48 = vpop.permute.xlu1 %529 }
  0xfe   : > { %v522_v26 = vpop.permute.xlu0 %521  ;;  %v611_v41 = vsel %vm604_vm8, %v602_v44, %v530_v48 }
  0xff   : > { %v607_v49 = vsel %vm604_vm8, %v598_v45, %v522_v26  ;;  %966 = vmatprep.mubr.msk.f32.mxu1 %vm625_vm9, %v611_v41 }
 0x100   : > { %960 = vmatprep.mubr.msk.f32.mxu0 %vm625_vm9, %v607_v49 }
 0x101   : > { %v532_v54 = vpop.permute.xlu1 %531 }
 0x102   : > { %v524_v55 = vpop.permute.xlu0 %523  ;;  %v612_v56 = vsel %vm604_vm8, %v603_v52, %v532_v54 }
 0x103   : > { %v608_v57 = vsel %vm604_vm8, %v599_v53, %v524_v55  ;;  %967 = vmatmul.mubr.msk.f32.gmra.mrb[2].mxu1 %vm625_vm9, %v612_v56 }
 0x104   : > { %961 = vmatmul.mubr.msk.f32.gmra.mrb[2].mxu0 %vm625_vm9, %v608_v57 }
 0x1ba   : > { %v965_v60 = vpop.f32.mrb[0].mxu1 }
 0x1bb   : > { %v959_v59 = vpop.f32.mrb[0].mxu0  ;;  %v746_v62 = vadd.f32 %v965_v60, %v921_v58  ;;  %v740_v0 = vpop.f32.mrb[1].mxu1 }
 0x1bc   : > { %v726_v61 = vadd.f32 %v959_v59, %v921_v58  ;;  %v720_v63 = vpop.f32.mrb[1].mxu0  ;;  %v741_v2 = vadd.f32 %v921_v58, %v740_v0 }
 0x1bd   : > { %v721_v1 = vadd.f32 %v921_v58, %v720_v63  ;;  %764 = vst.msk [vmem:[%s206_s20 + $0x28] sm:$0xff] %vm541_vm1, %v746_v62 }
 0x1be   : > { %760 = vst.msk [vmem:[%s206_s20 + $0x8] sm:$0xff] %vm541_vm1, %v726_v61  ;;  %763 = vst.msk [vmem:[%s206_s20 + $0x20] sm:$0xff] %vm541_vm1, %v741_v2 }
 0x1bf   : > { %759 = vst.msk [vmem:[%s206_s20] sm:$0xff] %vm541_vm1, %v721_v1 }
 0x1d6   : > { %v968_v6 = vpop.f32.mrb[2].mxu1 }
 0x1d7   : > { %v962_v5 = vpop.f32.mrb[2].mxu0  ;;  %v756_v7 = vadd.f32 %v968_v6, %v921_v58  ;;  %v750_v9 = vpop.f32.mrb[3].mxu1 }
 0x1d8   : > { %v736_v3 = vadd.f32 %v962_v5, %v921_v58  ;;  %v730_v8 = vpop.f32.mrb[3].mxu0  ;;  %v751_v11 = vadd.f32 %v921_v58, %v750_v9 }
 0x1d9   : > { %v731_v10 = vadd.f32 %v921_v58, %v730_v8  ;;  %766 = vst.msk [vmem:[%s206_s20 + $0x38] sm:$0xff] %vm541_vm1, %v756_v7 }
 0x1da   : > { %762 = vst.msk [vmem:[%s206_s20 + $0x18] sm:$0xff] %vm541_vm1, %v736_v3  ;;  %765 = vst.msk [vmem:[%s206_s20 + $0x30] sm:$0xff] %vm541_vm1, %v751_v11 }
 0x1db   : > { %761 = vst.msk [vmem:[%s206_s20 + $0x10] sm:$0xff] %vm541_vm1, %v731_v10 }
 0x1dc PF: > { %s13_s14 = sadd.s32 1, %s1038_s14   ;;  %s1426_s12 = smov %s1034_s13 }
 0x1dd   : > { %p10_p5 = scmp.ge.s32.totalorder %s13_s14, 4   ;;  %s1427_s13 = smov %s1429_s15 }
 0x1df   :  { %12 = sbr.rel (!%p10_p5) target bundleno = 2 (0x2), region = 67 }

</bundles_post_ra>
